<compile_context>
chip_gen: v7x
topology: tpu7x:2x2x1
jax: 0.10.0
libtpu: 0.0.40
codegen_flags: <defaults>
</compile_context>

<pallas_src>
import functools

import jax
import jax.numpy as jnp
import numpy as np
from jax.experimental import pallas as pl
from jax.experimental.pallas import tpu as pltpu


# ----------------------------------------------------------------------------
# Fused Pallas kernel: the entire EncModel forward for ONE task (grid = tasks)
# ----------------------------------------------------------------------------
def _enc_model_kernel(layout, slab_ref, xc_ref, yc_ref, x_ref, eps_ref, o_ref):
    f32 = jnp.float32

    def dot(a, b):
        return jnp.dot(a, b, preferred_element_type=f32)

    def p(name):                       # static slice into the parameter slab
        r0, nr, nc = layout[name]
        return slab_ref[r0:r0 + nr, 0:nc]

    n_aug = layout["d2mv_w"][2] // 2

    # ---- learner layer 1 first: the only 16-row work off the serial chain --
    h1 = jnp.maximum(dot(x_ref[...], p("l_w1")) + p("l_b1"), 0.0)

    # ---- TaskEnc (posterior branch); [x, y] concat folded into split W1 ----
    h = jnp.maximum(dot(xc_ref[...], p("te_w1x"))
                    + dot(yc_ref[...], p("te_w1y")) + p("te_b1"), 0.0)
    h = jnp.maximum(dot(h, p("te_w2")) + p("te_b2"), 0.0)
    post_deter = jnp.mean(dot(h, p("te_w3")) + p("te_b3"),
                          axis=0, keepdims=True)                  # (1, n_aug)

    # ---- Deter2Var (mean | var fused in one dot) + reparameterized sample --
    mv = dot(post_deter, p("d2mv_w")) + p("d2mv_b")               # (1, 2*n_aug)
    mean, prevar = mv[:, :n_aug], mv[:, n_aug:]
    # numerically-stable softplus, written out explicitly
    softplus = jnp.maximum(prevar, 0.0) + jnp.log1p(jnp.exp(-jnp.abs(prevar)))
    scale = 0.1 + 0.9 * softplus
    # rsample: mean + scale * eps  (eps drawn outside the kernel)
    task_code = mean + scale * eps_ref[...]                       # (1, n_aug)

    # ---- aug_vec | ParamEnc layer-1 fused in one dot ------------------------
    ap = dot(task_code, p("augpe_w")) + p("augpe_b")              # (1, n_aug+h0)
    aug = ap[:, :n_aug]                                           # no activation
    g = jnp.maximum(ap[:, n_aug:], 0.0)
    g = jnp.maximum(dot(g, p("pe_w2")) + p("pe_b2"), 0.0)
    task_emb = jnp.mean(dot(g, p("pe_w3")) + p("pe_b3"),
                        axis=0, keepdims=True)                    # (1, n_hid1)

    # encode_param gate: sigmoid(task_emb) * W3  ==  (h2 * gate) @ W3^T
    gate = jax.nn.sigmoid(task_emb)

    # ---- remaining LR-learner layers ----------------------------------------
    # aug is constant across rows -> fold aug @ W2_aug + b2 into one bias.
    b2_eff = dot(aug, p("l_w2a")) + p("l_b2")                     # (1, n_hid1)
    h2 = jnp.maximum(dot(h1, p("l_w2h")) + b2_eff, 0.0)
    o_ref[...] = dot(h2 * gate, p("l_w3")) + p("l_b3")


def make_enc_model_forward(layout):
    """Build the jitted batched forward for a fixed parameter layout."""
    kernel = functools.partial(_enc_model_kernel, layout)

    @jax.jit
    def forward(slab, x_comb, y_comb, x, eps):
        n_tasks, n_cmb, n_in = x_comb.shape
        n_y = y_comb.shape[-1]
        n_data = x.shape[1]
        n_aug = eps.shape[-1]
        n_out = layout["l_b3"][2]
        rows, lanes = slab.shape

        w_elems = sum(nr * nc for (_r0, nr, nc) in layout.values())
        cost = pl.CostEstimate(
            flops=int(2 * n_tasks * w_elems * max(n_cmb, n_data)),
            transcendentals=int(n_tasks * (4 * n_aug + 2 * layout["pe_b3"][2])),
            bytes_accessed=int(4 * (slab.size + x_comb.size + y_comb.size
                                    + x.size + eps.size
                                    + n_tasks * n_data * n_out)),
        )

        grid_spec = pltpu.PrefetchScalarGridSpec(
            num_scalar_prefetch=0,
            grid=(n_tasks,),
            in_specs=[
                # parameter slab: constant block index -> stays VMEM-resident
                pl.BlockSpec((rows, lanes), lambda t: (0, 0)),
                pl.BlockSpec((None, n_cmb, n_in), lambda t: (t, 0, 0)),
                pl.BlockSpec((None, n_cmb, n_y), lambda t: (t, 0, 0)),
                pl.BlockSpec((None, n_data, n_in), lambda t: (t, 0, 0)),
                pl.BlockSpec((None, 1, n_aug), lambda t: (t, 0, 0)),
            ],
            out_specs=pl.BlockSpec((None, n_data, n_out), lambda t: (t, 0, 0)),
        )
        return pl.pallas_call(
            kernel,
            out_shape=jax.ShapeDtypeStruct((n_tasks, n_data, n_out),
                                           jnp.float32),
            grid_spec=grid_spec,
            compiler_params=pltpu.CompilerParams(
                dimension_semantics=("parallel",)),
            cost_estimate=cost,
        )(slab, x_comb, y_comb, x, eps)

    return forward


# ----------------------------------------------------------------------------
# One-time parameter preparation: pack everything into ONE (R, 128) f32 slab
# ----------------------------------------------------------------------------
def prepare_kernel_params(params, n_hid0, n_in, n_out):
    def T(w):                                  # (out, in) -> (in, out)
        return np.asarray(w, np.float32).T

    def B(b):                                  # (out,) -> (1, out)
        return np.asarray(b, np.float32)[None, :]

    te = params["task_enc"]
    wm, bm, wv, bv = params["var_taskenc"]
    w_aug, b_aug = params["aug_vec"]
    pe = params["param_enc"]
    lw1, lb1, lw2, lb2, lw3, lb3 = params["learner"]

    te_w1 = T(te[0])                           # (n_xy, h_aug0)
    lw2t = T(lw2)                              # (n_hid0 + n_aug, n_hid1)

    entries = [
        ("te_w1x", te_w1[:n_in, :]),           # TaskEnc W1, x-feature block
        ("te_w1y", te_w1[n_in:, :]),           # TaskEnc W1, y-feature block
        ("te_b1", B(te[1])),
        ("te_w2", T(te[2])), ("te_b2", B(te[3])),
        ("te_w3", T(te[4])), ("te_b3", B(te[5])),
        # Deter2Var: mean | var fused along the output (lane) axis
        ("d2mv_w", np.concatenate([T(wm), T(wv)], axis=1)),
        ("d2mv_b", np.concatenate([B(bm), B(bv)], axis=1)),
        # aug_vec | ParamEnc layer-1 fused along the output axis
        ("augpe_w", np.concatenate([T(w_aug), T(pe[0])], axis=1)),
        ("augpe_b", np.concatenate([B(b_aug), B(pe[1])], axis=1)),
        ("pe_w2", T(pe[2])), ("pe_b2", B(pe[3])),
        ("pe_w3", T(pe[4])), ("pe_b3", B(pe[5])),
        ("l_w1", T(lw1)), ("l_b1", B(lb1)),
        ("l_w2h", lw2t[:n_hid0, :]),           # W2 block acting on h1
        ("l_w2a", lw2t[n_hid0:, :]),           # W2 block acting on aug
        ("l_b2", B(lb2)),
        ("l_w3", T(lw3)), ("l_b3", B(lb3)),
    ]

    lane = 128
    layout, row = {}, 0
    for name, arr in entries:
        nr, nc = arr.shape
        assert nc <= lane
        layout[name] = (row, nr, nc)
        row += -(-nr // 8) * 8                 # keep 8-sublane-aligned starts
    total_rows = -(-row // 8) * 8
    slab = np.zeros((total_rows, lane), np.float32)
    for name, arr in entries:
        r0, nr, nc = layout[name]
        slab[r0:r0 + nr, :nc] = arr
    return jnp.asarray(slab), layout


# ----------------------------------------------------------------------------
# Pure-JAX reference mirroring the PyTorch module exactly (single task)
# ----------------------------------------------------------------------------
def reference_forward(params, x_spt, y_spt, x_qry, y_qry, x, eps):
    def mlp3(inp, w1, b1, w2, b2, w3, b3):
        h = jnp.maximum(inp @ w1.T + b1, 0.0)
        h = jnp.maximum(h @ w2.T + b2, 0.0)
        return h @ w3.T + b3

    te = params["task_enc"]
    xy_comb = jnp.concatenate(
        [jnp.concatenate([x_spt, x_qry], 0),
         jnp.concatenate([y_spt, y_qry], 0)], axis=-1)
    post_deter = jnp.mean(mlp3(xy_comb, *te), axis=0, keepdims=True)
    wm, bm, wv, bv = params["var_taskenc"]
    mean = post_deter @ wm.T + bm
    scale = 0.1 + 0.9 * jax.nn.softplus(post_deter @ wv.T + bv)
    task_code = mean + scale * eps
    w_aug, b_aug = params["aug_vec"]
    aug = task_code @ w_aug.T + b_aug
    task_emb = jnp.mean(mlp3(task_code, *params["param_enc"]),
                        axis=0, keepdims=True)
    w1, b1, w2, b2, w3, b3 = params["learner"]
    w3_adapt = jax.nn.sigmoid(task_emb) * w3
    h = jnp.maximum(x @ w1.T + b1, 0.0)
    h = jnp.concatenate([h, jnp.tile(aug, (x.shape[0], 1))], axis=-1)
    h = jnp.maximum(h @ w2.T + b2, 0.0)
    return h @ w3_adapt.T + b3


# ----------------------------------------------------------------------------
# Deterministic parameter init (PyTorch (out, in) convention)
# ----------------------------------------------------------------------------
def kaiming(key, out_dim, in_dim):
    return (jax.random.normal(key, (out_dim, in_dim), jnp.float32)
            * jnp.sqrt(2.0 / in_dim))


def xavier(key, out_dim, in_dim):
    return (jax.random.normal(key, (out_dim, in_dim), jnp.float32)
            * jnp.sqrt(2.0 / (in_dim + out_dim)))


def make_params(key, n_in, n_hid, n_out, n_out_aug, n_xy, n_hid_aug,
                n_hid_emb, n_out_emb):
    ks = list(jax.random.split(key, 12))
    z = lambda d: jnp.zeros((d,), jnp.float32)
    return {
        "task_enc": (
            xavier(ks[0], n_hid_aug[0], n_xy), z(n_hid_aug[0]),
            xavier(ks[1], n_hid_aug[1], n_hid_aug[0]), z(n_hid_aug[1]),
            xavier(ks[2], n_out_aug, n_hid_aug[1]), z(n_out_aug),
        ),
        "var_taskenc": (
            xavier(ks[3], n_out_aug, n_out_aug), z(n_out_aug),
            xavier(ks[4], n_out_aug, n_out_aug), z(n_out_aug),
        ),
        "param_enc": (
            xavier(ks[5], n_hid_emb[0], n_out_aug), z(n_hid_emb[0]),
            xavier(ks[6], n_hid_emb[1], n_hid_emb[0]), z(n_hid_emb[1]),
            xavier(ks[7], n_out_emb, n_hid_emb[1]), z(n_out_emb),
        ),
        "aug_vec": (xavier(ks[8], n_out_aug, n_out_aug), z(n_out_aug)),
        "learner": (
            kaiming(ks[9], n_hid[0], n_in), z(n_hid[0]),
            kaiming(ks[10], n_hid[1], n_hid[0] + n_out_aug), z(n_hid[1]),
            kaiming(ks[11], n_out, n_hid[1]), z(n_out),
        ),
    }


# ----------------------------------------------------------------------------
if __name__ == "__main__":
    # Small shapes consistent with the module (regression meta-learning).
    n_in, n_out = 4, 2
    n_hid = (32, 32)
    n_out_aug = 8
    n_xy = n_in + n_out                 # TaskEnc input dim = cat([x, y])
    n_hid_aug = (32, 32)
    n_hid_emb = (32, 32)
    n_out_emb = n_hid[1]                # must broadcast against linear3.weight
    n_spt, n_qry, n_data = 8, 8, 16
    n_tasks = 8                         # grid axis; "parallel" on v7x megacore

    key = jax.random.PRNGKey(0)
    kp, kd = jax.random.split(key)
    params = make_params(kp, n_in, n_hid, n_out, n_out_aug, n_xy, n_hid_aug,
                         n_hid_emb, n_out_emb)
    slab, layout = prepare_kernel_params(params, n_hid[0], n_in, n_out)
    fwd = make_enc_model_forward(layout)

    ks = jax.random.split(kd, 6)
    x_spt = jax.random.normal(ks[0], (n_tasks, n_spt, n_in), jnp.float32)
    y_spt = jax.random.normal(ks[1], (n_tasks, n_spt, n_out), jnp.float32)
    x_qry = jax.random.normal(ks[2], (n_tasks, n_qry, n_in), jnp.float32)
    y_qry = jax.random.normal(ks[3], (n_tasks, n_qry, n_out), jnp.float32)
    x = jax.random.normal(ks[4], (n_tasks, n_data, n_in), jnp.float32)
    # TODO(synk): torch.distributions.Normal.rsample has no Pallas equivalent;
    # the reparameterized sample uses this externally drawn eps inside the kernel.
    eps = jax.random.normal(ks[5], (n_tasks, 1, n_out_aug), jnp.float32)

    # Per-task row stacking of support+query (data prep; [x,y] feature concat
    # is folded into the kernel via the split TaskEnc W1).
    x_comb = jnp.concatenate([x_spt, x_qry], axis=1)
    y_comb = jnp.concatenate([y_spt, y_qry], axis=1)

    out = jax.block_until_ready(fwd(slab, x_comb, y_comb, x, eps))

    refs = [reference_forward(params, x_spt[t], y_spt[t], x_qry[t], y_qry[t],
                              x[t], eps[t]) for t in range(n_tasks)]
    ref = jax.block_until_ready(jnp.stack(refs, axis=0))

    assert out.shape == (n_tasks, n_data, n_out)
    np.testing.assert_allclose(np.asarray(out), np.asarray(ref),
                               rtol=5e-3, atol=5e-3)
    print("KERNEL_OK")
</pallas_src>

<mosaic_0001>
module attributes {stable_mosaic.version = 11 : i64} {
  func.func @_enc_model_kernel(%arg0: i32, %arg1: memref<320x128xf32, #tpu.memory_space<vmem>>, %arg2: memref<1x16x4xf32, #tpu.memory_space<vmem>>, %arg3: memref<1x16x2xf32, #tpu.memory_space<vmem>>, %arg4: memref<1x16x4xf32, #tpu.memory_space<vmem>>, %arg5: memref<1x1x8xf32, #tpu.memory_space<vmem>>, %arg6: memref<1x16x2xf32, #tpu.memory_space<vmem>>) attributes {dimension_semantics = [#tpu.dimension_semantics<parallel>], iteration_bounds = array<i64: 8>, scalar_prefetch = 0 : i64, scratch_operands = 0 : i64, tpu.core_type = #tpu.core_type<tc>, window_params = [{pipeline_mode = #tpu.pipeline_mode<synchronous>, transform_indices = @transform_0, window_bounds = array<i64: 320, 128>}, {transform_indices = @transform_1, window_bounds = array<i64: 1, 16, 4>}, {transform_indices = @transform_2, window_bounds = array<i64: 1, 16, 2>}, {transform_indices = @transform_3, window_bounds = array<i64: 1, 16, 4>}, {transform_indices = @transform_4, window_bounds = array<i64: 1, 1, 8>}, {transform_indices = @transform_5, window_bounds = array<i64: 1, 16, 2>}]} {
    %c0 = arith.constant 0 : index
    %c0_0 = arith.constant 0 : index
    %c0_1 = arith.constant 0 : index
    %0 = vector.load %arg4[%c0, %c0_0, %c0_1] : memref<1x16x4xf32, #tpu.memory_space<vmem>>, vector<1x16x4xf32>
    %1 = vector.shape_cast %0 : vector<1x16x4xf32> to vector<16x4xf32>
    %c216 = arith.constant 216 : index
    %c0_2 = arith.constant 0 : index
    %2 = vector.load %arg1[%c216, %c0_2] : memref<320x128xf32, #tpu.memory_space<vmem>>, vector<4x32xf32>
    %cst = arith.constant dense<0.000000e+00> : vector<16x32xf32>
    %3 = tpu.matmul %1, %2, %cst {dimension_numbers = #tpu.dot_dimension_numbers<[1], [0], [0], [1], [0, 0, 1, 1], [], []>} : vector<16x4xf32>, vector<4x32xf32>, vector<16x32xf32> -> vector<16x32xf32>
    %c224 = arith.constant 224 : index
    %c0_3 = arith.constant 0 : index
    %4 = vector.load %arg1[%c224, %c0_3] : memref<320x128xf32, #tpu.memory_space<vmem>>, vector<1x32xf32>
    %5 = vector.broadcast %4 : vector<1x32xf32> to vector<16x32xf32>
    %6 = arith.addf %3, %5 : vector<16x32xf32>
    %cst_4 = arith.constant 0.000000e+00 : f32
    %7 = vector.broadcast %cst_4 : f32 to vector<16x32xf32>
    %8 = arith.maximumf %6, %7 : vector<16x32xf32>
    %c0_5 = arith.constant 0 : index
    %c0_6 = arith.constant 0 : index
    %c0_7 = arith.constant 0 : index
    %9 = vector.load %arg2[%c0_5, %c0_6, %c0_7] : memref<1x16x4xf32, #tpu.memory_space<vmem>>, vector<1x16x4xf32>
    %10 = vector.shape_cast %9 : vector<1x16x4xf32> to vector<16x4xf32>
    %c0_8 = arith.constant 0 : index
    %c0_9 = arith.constant 0 : index
    %11 = vector.load %arg1[%c0_8, %c0_9] : memref<320x128xf32, #tpu.memory_space<vmem>>, vector<4x32xf32>
    %cst_10 = arith.constant dense<0.000000e+00> : vector<16x32xf32>
    %12 = tpu.matmul %10, %11, %cst_10 {dimension_numbers = #tpu.dot_dimension_numbers<[1], [0], [0], [1], [0, 0, 1, 1], [], []>} : vector<16x4xf32>, vector<4x32xf32>, vector<16x32xf32> -> vector<16x32xf32>
    %c0_11 = arith.constant 0 : index
    %c0_12 = arith.constant 0 : index
    %c0_13 = arith.constant 0 : index
    %13 = vector.load %arg3[%c0_11, %c0_12, %c0_13] : memref<1x16x2xf32, #tpu.memory_space<vmem>>, vector<1x16x2xf32>
    %14 = vector.shape_cast %13 : vector<1x16x2xf32> to vector<16x2xf32>
    %c8 = arith.constant 8 : index
    %c0_14 = arith.constant 0 : index
    %15 = vector.load %arg1[%c8, %c0_14] : memref<320x128xf32, #tpu.memory_space<vmem>>, vector<2x32xf32>
    %cst_15 = arith.constant dense<0.000000e+00> : vector<16x32xf32>
    %16 = tpu.matmul %14, %15, %cst_15 {dimension_numbers = #tpu.dot_dimension_numbers<[1], [0], [0], [1], [0, 0, 1, 1], [], []>} : vector<16x2xf32>, vector<2x32xf32>, vector<16x32xf32> -> vector<16x32xf32>
    %17 = arith.addf %12, %16 : vector<16x32xf32>
    %c16 = arith.constant 16 : index
    %c0_16 = arith.constant 0 : index
    %18 = vector.load %arg1[%c16, %c0_16] : memref<320x128xf32, #tpu.memory_space<vmem>>, vector<1x32xf32>
    %19 = vector.broadcast %18 : vector<1x32xf32> to vector<16x32xf32>
    %20 = arith.addf %17, %19 : vector<16x32xf32>
    %cst_17 = arith.constant 0.000000e+00 : f32
    %21 = vector.broadcast %cst_17 : f32 to vector<16x32xf32>
    %22 = arith.maximumf %20, %21 : vector<16x32xf32>
    %c24 = arith.constant 24 : index
    %c0_18 = arith.constant 0 : index
    %23 = vector.load %arg1[%c24, %c0_18] : memref<320x128xf32, #tpu.memory_space<vmem>>, vector<32x32xf32>
    %cst_19 = arith.constant dense<0.000000e+00> : vector<16x32xf32>
    %24 = tpu.matmul %22, %23, %cst_19 {dimension_numbers = #tpu.dot_dimension_numbers<[1], [0], [0], [1], [0, 0, 1, 1], [], []>} : vector<16x32xf32>, vector<32x32xf32>, vector<16x32xf32> -> vector<16x32xf32>
    %c56 = arith.constant 56 : index
    %c0_20 = arith.constant 0 : index
    %25 = vector.load %arg1[%c56, %c0_20] : memref<320x128xf32, #tpu.memory_space<vmem>>, vector<1x32xf32>
    %26 = vector.broadcast %25 : vector<1x32xf32> to vector<16x32xf32>
    %27 = arith.addf %24, %26 : vector<16x32xf32>
    %cst_21 = arith.constant 0.000000e+00 : f32
    %28 = vector.broadcast %cst_21 : f32 to vector<16x32xf32>
    %29 = arith.maximumf %27, %28 : vector<16x32xf32>
    %c64 = arith.constant 64 : index
    %c0_22 = arith.constant 0 : index
    %30 = vector.load %arg1[%c64, %c0_22] : memref<320x128xf32, #tpu.memory_space<vmem>>, vector<32x8xf32>
    %cst_23 = arith.constant dense<0.000000e+00> : vector<16x8xf32>
    %31 = tpu.matmul %29, %30, %cst_23 {dimension_numbers = #tpu.dot_dimension_numbers<[1], [0], [0], [1], [0, 0, 1, 1], [], []>} : vector<16x32xf32>, vector<32x8xf32>, vector<16x8xf32> -> vector<16x8xf32>
    %c96 = arith.constant 96 : index
    %c0_24 = arith.constant 0 : index
    %32 = vector.load %arg1[%c96, %c0_24] : memref<320x128xf32, #tpu.memory_space<vmem>>, vector<1x8xf32>
    %33 = vector.broadcast %32 : vector<1x8xf32> to vector<16x8xf32>
    %34 = arith.addf %31, %33 : vector<16x8xf32>
    %cst_25 = arith.constant dense<0.000000e+00> : vector<8xf32>
    %35 = vector.multi_reduction <add>, %34, %cst_25 [0] : vector<16x8xf32> to vector<8xf32>
    %36 = vector.shape_cast %35 : vector<8xf32> to vector<1x8xf32>
    %cst_26 = arith.constant 1.600000e+01 : f32
    %37 = vector.broadcast %cst_26 : f32 to vector<1x8xf32>
    %38 = arith.divf %36, %37 : vector<1x8xf32>
    %c104 = arith.constant 104 : index
    %c0_27 = arith.constant 0 : index
    %39 = vector.load %arg1[%c104, %c0_27] : memref<320x128xf32, #tpu.memory_space<vmem>>, vector<8x16xf32>
    %cst_28 = arith.constant dense<0.000000e+00> : vector<1x16xf32>
    %40 = tpu.matmul %38, %39, %cst_28 {dimension_numbers = #tpu.dot_dimension_numbers<[1], [0], [0], [1], [0, 0, 1, 1], [], []>} : vector<1x8xf32>, vector<8x16xf32>, vector<1x16xf32> -> vector<1x16xf32>
    %c112 = arith.constant 112 : index
    %c0_29 = arith.constant 0 : index
    %41 = vector.load %arg1[%c112, %c0_29] : memref<320x128xf32, #tpu.memory_space<vmem>>, vector<1x16xf32>
    %42 = arith.addf %40, %41 : vector<1x16xf32>
    %43 = vector.extract_strided_slice %42 {offsets = [0, 0], sizes = [1, 8], strides = [1, 1]} : vector<1x16xf32> to vector<1x8xf32>
    %44 = vector.extract_strided_slice %42 {offsets = [0, 8], sizes = [1, 8], strides = [1, 1]} : vector<1x16xf32> to vector<1x8xf32>
    %cst_30 = arith.constant 0.000000e+00 : f32
    %45 = vector.broadcast %cst_30 : f32 to vector<1x8xf32>
    %46 = arith.maximumf %44, %45 : vector<1x8xf32>
    %47 = math.absf %44 : vector<1x8xf32>
    %cst_31 = arith.constant 0.000000e+00 : f32
    %48 = vector.broadcast %cst_31 : f32 to vector<1x8xf32>
    %49 = arith.subf %48, %47 : vector<1x8xf32>
    %50 = math.exp %49 : vector<1x8xf32>
    %51 = math.log1p %50 : vector<1x8xf32>
    %52 = arith.addf %46, %51 : vector<1x8xf32>
    %cst_32 = arith.constant 0.899999976 : f32
    %53 = vector.broadcast %cst_32 : f32 to vector<1x8xf32>
    %54 = arith.mulf %53, %52 : vector<1x8xf32>
    %cst_33 = arith.constant 1.000000e-01 : f32
    %55 = vector.broadcast %cst_33 : f32 to vector<1x8xf32>
    %56 = arith.addf %55, %54 : vector<1x8xf32>
    %c0_34 = arith.constant 0 : index
    %c0_35 = arith.constant 0 : index
    %c0_36 = arith.constant 0 : index
    %57 = vector.load %arg5[%c0_34, %c0_35, %c0_36] : memref<1x1x8xf32, #tpu.memory_space<vmem>>, vector<1x1x8xf32>
    %58 = vector.shape_cast %57 : vector<1x1x8xf32> to vector<1x8xf32>
    %59 = arith.mulf %56, %58 : vector<1x8xf32>
    %60 = arith.addf %43, %59 : vector<1x8xf32>
    %c120 = arith.constant 120 : index
    %c0_37 = arith.constant 0 : index
    %61 = vector.load %arg1[%c120, %c0_37] : memref<320x128xf32, #tpu.memory_space<vmem>>, vector<8x40xf32>
    %cst_38 = arith.constant dense<0.000000e+00> : vector<1x40xf32>
    %62 = tpu.matmul %60, %61, %cst_38 {dimension_numbers = #tpu.dot_dimension_numbers<[1], [0], [0], [1], [0, 0, 1, 1], [], []>} : vector<1x8xf32>, vector<8x40xf32>, vector<1x40xf32> -> vector<1x40xf32>
    %c128 = arith.constant 128 : index
    %c0_39 = arith.constant 0 : index
    %63 = vector.load %arg1[%c128, %c0_39] : memref<320x128xf32, #tpu.memory_space<vmem>>, vector<1x40xf32>
    %64 = arith.addf %62, %63 : vector<1x40xf32>
    %65 = vector.extract_strided_slice %64 {offsets = [0, 0], sizes = [1, 8], strides = [1, 1]} : vector<1x40xf32> to vector<1x8xf32>
    %66 = vector.extract_strided_slice %64 {offsets = [0, 8], sizes = [1, 32], strides = [1, 1]} : vector<1x40xf32> to vector<1x32xf32>
    %cst_40 = arith.constant 0.000000e+00 : f32
    %67 = vector.broadcast %cst_40 : f32 to vector<1x32xf32>
    %68 = arith.maximumf %66, %67 : vector<1x32xf32>
    %c136 = arith.constant 136 : index
    %c0_41 = arith.constant 0 : index
    %69 = vector.load %arg1[%c136, %c0_41] : memref<320x128xf32, #tpu.memory_space<vmem>>, vector<32x32xf32>
    %cst_42 = arith.constant dense<0.000000e+00> : vector<1x32xf32>
    %70 = tpu.matmul %68, %69, %cst_42 {dimension_numbers = #tpu.dot_dimension_numbers<[1], [0], [0], [1], [0, 0, 1, 1], [], []>} : vector<1x32xf32>, vector<32x32xf32>, vector<1x32xf32> -> vector<1x32xf32>
    %c168 = arith.constant 168 : index
    %c0_43 = arith.constant 0 : index
    %71 = vector.load %arg1[%c168, %c0_43] : memref<320x128xf32, #tpu.memory_space<vmem>>, vector<1x32xf32>
    %72 = arith.addf %70, %71 : vector<1x32xf32>
    %cst_44 = arith.constant 0.000000e+00 : f32
    %73 = vector.broadcast %cst_44 : f32 to vector<1x32xf32>
    %74 = arith.maximumf %72, %73 : vector<1x32xf32>
    %c176 = arith.constant 176 : index
    %c0_45 = arith.constant 0 : index
    %75 = vector.load %arg1[%c176, %c0_45] : memref<320x128xf32, #tpu.memory_space<vmem>>, vector<32x32xf32>
    %cst_46 = arith.constant dense<0.000000e+00> : vector<1x32xf32>
    %76 = tpu.matmul %74, %75, %cst_46 {dimension_numbers = #tpu.dot_dimension_numbers<[1], [0], [0], [1], [0, 0, 1, 1], [], []>} : vector<1x32xf32>, vector<32x32xf32>, vector<1x32xf32> -> vector<1x32xf32>
    %c208 = arith.constant 208 : index
    %c0_47 = arith.constant 0 : index
    %77 = vector.load %arg1[%c208, %c0_47] : memref<320x128xf32, #tpu.memory_space<vmem>>, vector<1x32xf32>
    %78 = arith.addf %76, %77 : vector<1x32xf32>
    %cst_48 = arith.constant dense<0.000000e+00> : vector<32xf32>
    %79 = vector.multi_reduction <add>, %78, %cst_48 [0] : vector<1x32xf32> to vector<32xf32>
    %80 = vector.shape_cast %79 : vector<32xf32> to vector<1x32xf32>
    %cst_49 = arith.constant 1.000000e+00 : f32
    %81 = vector.broadcast %cst_49 : f32 to vector<1x32xf32>
    %82 = arith.divf %80, %81 : vector<1x32xf32>
    %83 = arith.negf %82 : vector<1x32xf32>
    %84 = math.exp %83 : vector<1x32xf32>
    %cst_50 = arith.constant 1.000000e+00 : f32
    %85 = vector.broadcast %cst_50 : f32 to vector<1x32xf32>
    %86 = arith.addf %85, %84 : vector<1x32xf32>
    %87 = arith.divf %85, %86 : vector<1x32xf32>
    %c264 = arith.constant 264 : index
    %c0_51 = arith.constant 0 : index
    %88 = vector.load %arg1[%c264, %c0_51] : memref<320x128xf32, #tpu.memory_space<vmem>>, vector<8x32xf32>
    %cst_52 = arith.constant dense<0.000000e+00> : vector<1x32xf32>
    %89 = tpu.matmul %65, %88, %cst_52 {dimension_numbers = #tpu.dot_dimension_numbers<[1], [0], [0], [1], [0, 0, 1, 1], [], []>} : vector<1x8xf32>, vector<8x32xf32>, vector<1x32xf32> -> vector<1x32xf32>
    %c272 = arith.constant 272 : index
    %c0_53 = arith.constant 0 : index
    %90 = vector.load %arg1[%c272, %c0_53] : memref<320x128xf32, #tpu.memory_space<vmem>>, vector<1x32xf32>
    %91 = arith.addf %89, %90 : vector<1x32xf32>
    %c232 = arith.constant 232 : index
    %c0_54 = arith.constant 0 : index
    %92 = vector.load %arg1[%c232, %c0_54] : memref<320x128xf32, #tpu.memory_space<vmem>>, vector<32x32xf32>
    %cst_55 = arith.constant dense<0.000000e+00> : vector<16x32xf32>
    %93 = tpu.matmul %8, %92, %cst_55 {dimension_numbers = #tpu.dot_dimension_numbers<[1], [0], [0], [1], [0, 0, 1, 1], [], []>} : vector<16x32xf32>, vector<32x32xf32>, vector<16x32xf32> -> vector<16x32xf32>
    %94 = vector.broadcast %91 : vector<1x32xf32> to vector<16x32xf32>
    %95 = arith.addf %93, %94 : vector<16x32xf32>
    %cst_56 = arith.constant 0.000000e+00 : f32
    %96 = vector.broadcast %cst_56 : f32 to vector<16x32xf32>
    %97 = arith.maximumf %95, %96 : vector<16x32xf32>
    %98 = vector.broadcast %87 : vector<1x32xf32> to vector<16x32xf32>
    %99 = arith.mulf %97, %98 : vector<16x32xf32>
    %c280 = arith.constant 280 : index
    %c0_57 = arith.constant 0 : index
    %100 = vector.load %arg1[%c280, %c0_57] : memref<320x128xf32, #tpu.memory_space<vmem>>, vector<32x2xf32>
    %cst_58 = arith.constant dense<0.000000e+00> : vector<16x2xf32>
    %101 = tpu.matmul %99, %100, %cst_58 {dimension_numbers = #tpu.dot_dimension_numbers<[1], [0], [0], [1], [0, 0, 1, 1], [], []>} : vector<16x32xf32>, vector<32x2xf32>, vector<16x2xf32> -> vector<16x2xf32>
    %c312 = arith.constant 312 : index
    %c0_59 = arith.constant 0 : index
    %102 = vector.load %arg1[%c312, %c0_59] : memref<320x128xf32, #tpu.memory_space<vmem>>, vector<1x2xf32>
    %103 = vector.broadcast %102 : vector<1x2xf32> to vector<16x2xf32>
    %104 = arith.addf %101, %103 : vector<16x2xf32>
    %c0_60 = arith.constant 0 : index
    %c0_61 = arith.constant 0 : index
    %c0_62 = arith.constant 0 : index
    %105 = vector.load %arg6[%c0_60, %c0_61, %c0_62] : memref<1x16x2xf32, #tpu.memory_space<vmem>>, vector<1x16x2xf32>
    %106 = vector.shape_cast %105 : vector<1x16x2xf32> to vector<16x2xf32>
    %107 = vector.shape_cast %104 : vector<16x2xf32> to vector<1x16x2xf32>
    tpu.vector_store %arg6[%c0_60, %c0_61, %c0_62], %107 {strides = array<i32>} : memref<1x16x2xf32, #tpu.memory_space<vmem>>, vector<1x16x2xf32>,
    return
  }
  func.func @transform_0(%arg0: i32) -> (i32, i32) {
    %c0_i32 = arith.constant 0 : i32
    %c0_i32_0 = arith.constant 0 : i32
    %c0_i32_1 = arith.constant 0 : i32
    return %c0_i32, %c0_i32_0 : i32, i32
  }
  func.func @transform_1(%arg0: i32) -> (i32, i32, i32) {
    %c0_i32 = arith.constant 0 : i32
    %c0_i32_0 = arith.constant 0 : i32
    %c0_i32_1 = arith.constant 0 : i32
    return %arg0, %c0_i32, %c0_i32_0 : i32, i32, i32
  }
  func.func @transform_2(%arg0: i32) -> (i32, i32, i32) {
    %c0_i32 = arith.constant 0 : i32
    %c0_i32_0 = arith.constant 0 : i32
    %c0_i32_1 = arith.constant 0 : i32
    return %arg0, %c0_i32, %c0_i32_0 : i32, i32, i32
  }
  func.func @transform_3(%arg0: i32) -> (i32, i32, i32) {
    %c0_i32 = arith.constant 0 : i32
    %c0_i32_0 = arith.constant 0 : i32
    %c0_i32_1 = arith.constant 0 : i32
    return %arg0, %c0_i32, %c0_i32_0 : i32, i32, i32
  }
  func.func @transform_4(%arg0: i32) -> (i32, i32, i32) {
    %c0_i32 = arith.constant 0 : i32
    %c0_i32_0 = arith.constant 0 : i32
    %c0_i32_1 = arith.constant 0 : i32
    return %arg0, %c0_i32, %c0_i32_0 : i32, i32, i32
  }
  func.func @transform_5(%arg0: i32) -> (i32, i32, i32) {
    %c0_i32 = arith.constant 0 : i32
    %c0_i32_0 = arith.constant 0 : i32
    %c0_i32_1 = arith.constant 0 : i32
    return %arg0, %c0_i32, %c0_i32_0 : i32, i32, i32
  }
}

</mosaic_0001>

<bundles_post_ra>
// kernel: forward.1
= control target key start
LH: loop header
LB: loop body
LE: loop exit
PB: predicated region body
PF: predicated region fallthrough
CT: control target
= control target key end

     0   :  { %s1759_s18 = smov 0   ;;  %s1957_s0 = inlined_call_operand.vmem [shape: f32[320,128], index: 0, kind: input, shape index: {}]   ;;  %s1958_s1 = inlined_call_operand.vmem [shape: f32[8,16,4], index: 1, kind: input, shape index: {}]   ;;  %s1959_s2 = inlined_call_operand.vmem [shape: f32[8,16,2], index: 2, kind: input, shape index: {}]   ;;  %s1960_s3 = inlined_call_operand.vmem [shape: f32[8,16,4], index: 3, kind: input, shape index: {}]   ;;  %s1961_s4 = inlined_call_operand.vmem [shape: f32[8,1,8], index: 4, kind: input, shape index: {}]   ;;  %s1962_s5 = inlined_call_operand.vmem [shape: f32[8,16,2], index: 5, kind: output, shape index: {}]  }
   0x1 LB: > { %s1456_s19 = sadd.s32 4294967295, %s1722_s18   ;;  %p1460_p0 = scmp.ge.s32.totalorder %s1722_s18, 1  ;;  %s1722_s18 = sphi %s1759_s18, %s15_s18  }
   0x2   : > { %p215_p1 = scmp.lt.s32.totalorder %s1722_s18, 9 }
   0x4   : > { %p216_p2 = pnand %p1460_p0, %p215_p1 }
   0x5   : > { %v380_v0 = vld [vmem:[%s1957_s0 + $0x8] sm:$0x3] (!%p216_p2)  ;;  %vm388_vm0 = vcmask (!%p216_p2), 1041408   ;;  %p256_p3 = scmp.lt.s32.totalorder (!%p216_p2), %s1456_s19, 7  ;;  %vm294_vm1 = vcmask (!%p216_p2), 1043456   ;;  %v560_v3 = vld [vmem:[%s1957_s0 + $0x18] sm:$0xff] (!%p216_p2) }
   0x6   : > { %219 = sbr.rel (%p216_p2) target bundleno = 2074 (0x81a), region = 40  ;;  %1558 = vmatprep.subr.msk.mxu1 (!%p216_p2), %vm388_vm0, %v380_v0  ;;  %v377_v1 = vld [vmem:[%s1957_s0] sm:$0xf] (!%p216_p2)  ;;  %v281_v2 = vld [vmem:[%s1957_s0 + $0xd8] sm:$0xf] (!%p216_p2)  ;;  %vm381_vm2 = vcmask (!%p216_p2), 15360  }
   0x7   : > { %1559 = vmatpush3.msk.msra.mxu1 (!%p216_p2), %vm388_vm0, %v380_v0  ;;  %1553 = vmatprep.subr.msk.mxu0 (!%p216_p2), %vm294_vm1, %v281_v2  ;;  %v561_v4 = vld [vmem:[%s1957_s0 + $0x20] sm:$0xff] (!%p216_p2)  ;;  %vm287_vm3 = vcmask (!%p216_p2), 31744   ;;  %v562_v12 = vld [vmem:[%s1957_s0 + $0x28] sm:$0xff] (!%p216_p2)  ;;  %v563_v13 = vld [vmem:[%s1957_s0 + $0x30] sm:$0xff] (!%p216_p2)  ;;  %vm569_vm4 = vcmask (!%p216_p2), 261120   ;;  %v1724_v37 = vmov (!%p216_p2), 0.0  }
   0x8   : > { %1563 = vmatprep.subr.msk.mxu1 (!%p216_p2), %vm294_vm1, %v377_v1  ;;  %1554 = vmatpush3.msk.msra.mxu0 (!%p216_p2), %vm294_vm1, %v281_v2  ;;  %v1649_v5 = vpack.c.bf16 (!%p216_p2), %v561_v4, %v560_v3  ;;  %v1653_v14 = vpack.c.bf16 (!%p216_p2), %v563_v13, %v562_v12  ;;  %v653_v15 = vld [vmem:[%s1957_s0 + $0x40] sm:$0xff] (!%p216_p2)  ;;  %v654_v16 = vld [vmem:[%s1957_s0 + $0x48] sm:$0xff] (!%p216_p2)  ;;  %v1479_v20 = vld [vmem:[%s1957_s0 + $0x10] ss:$0 sm:$0xff] (!%p216_p2)  ;;  %vm1725_vm5 = vmmov (!%p216_p2), 0   ;;  %vm743_vm6 = vcmask (!%p216_p2), 64512  }
   0x9   : > { %v1657_v17 = vpack.c.bf16 (!%p216_p2), %v654_v16, %v653_v15  ;;  %v655_v27 = vld [vmem:[%s1957_s0 + $0x50] sm:$0xff] (!%p216_p2)  ;;  %v656_v28 = vld [vmem:[%s1957_s0 + $0x58] sm:$0xff] (!%p216_p2)  ;;  %v755_v38 = vld [vmem:[%s1957_s0 + $0x68] sm:$0xff] (!%p216_p2)  ;;  %s1727_s22 = smov (!%p216_p2), 120  }
   0xa   : > { %1650 = vmatprep.subr.bf16.mxu0 (!%p216_p2), %v1649_v5  ;;  %v1661_v29 = vpack.c.bf16 (!%p216_p2), %v656_v28, %v655_v27  ;;  %v1480_v30 = vld [vmem:[%s1957_s0 + $0x38] ss:$0 sm:$0xff] (!%p216_p2)  ;;  %v1483_v40 = vld [vmem:[%s1957_s0 + $0x60] ss:$0 sm:$0xff] (!%p216_p2)  ;;  %v756_v56 = vld [vmem:[%s1957_s0 + $0x70] sm:$0x1] (!%p216_p2) }
   0xb   : > { %v862_v55 = vld [vmem:[%s1957_s0 + $0x78] sm:$0xff] (!%p216_p2)  ;;  %v938_v16 = vld [vmem:[%s1957_s0 + $0x88] sm:$0xff] (!%p216_p2)  ;;  %v863_v28 = vld [vmem:[%s1957_s0 + $0x80] sm:$0x1] (!%p216_p2) }
   0xd   : > { %s1964_s19 = smov (!%p256_p3, %s1456_s19), 7 }
   0xe   : > { %s1788_s30 = sshll.u32 %s1964_s19, 4  ;;  %s273_s13 = scalar_lea.vmem %s1961_s4, %s1964_s19 }
   0xf   : > { %s265_s8 = scalar_lea.vmem %s1959_s2, %s1788_s30  ;;  %s260_s11 = scalar_lea.vmem %s1958_s1, %s1788_s30  ;;  %v1487_v39 = vld [vmem:[%s273_s13] ss:$0 sm:$0xff] }
  0x10   : > { %v378_v6 = vld [vmem:[%s265_s8] sm:$0xff]  ;;  %v379_v7 = vld [vmem:[%s265_s8 + $0x8] sm:$0xff]  ;;  %s270_s14 = scalar_lea.vmem %s1960_s3, %s1788_s30  ;;  %s278_s25 = scalar_lea.vmem %s1962_s5, %s1788_s30 }
  0x11   : > { %v375_v8 = vld [vmem:[%s260_s11] sm:$0xff]  ;;  %1560 = vmatprep.mubr.msk.f32.mxu1 %vm381_vm2, %v378_v6  ;;  %v280_v10 = vld [vmem:[%s270_s14 + $0x8] sm:$0xff] }
  0x12   : > { %v279_v9 = vld [vmem:[%s270_s14] sm:$0xff]  ;;  %1561 = vmatmul.mubr.msk.f32.vlgmr.msra.gmra.mrb[0].mxu1 %vm381_vm2, %v379_v7  ;;  %v376_v11 = vld [vmem:[%s260_s11 + $0x8] sm:$0xff]  ;;  %s1726_s14 = smov 8  }
  0x13   : > { %1555 = vmatprep.mubr.msk.f32.mxu0 %vm287_vm3, %v279_v9  ;;  %1564 = vmatpush3.msk.msra.mxu1 %vm294_vm1, %v377_v1 }
  0x14   : > { %1565 = vmatprep.mubr.msk.f32.mxu1 %vm287_vm3, %v375_v8  ;;  %1556 = vmatmul.mubr.msk.f32.vlgmr.msra.gmra.mrb[0].mxu0 %vm287_vm3, %v280_v10 }
  0x15   : > { %1652 = vmatpush3.bf16.msra.mxu0 %v1649_v5  ;;  %1658 = vmatprep.subr.bf16.mxu1 %v1657_v17 }
  0x16   : > { %1654 = vmatprep.subr.bf16.mxu0 %v1653_v14  ;;  %853 = vrot.lane.b32.xlu0 %v1487_v39, %s1726_s14  ;;  %v1179_v39 = vld [vmem:[%s1957_s0 + $0xe8] sm:$0xff] }
  0x19   : > { %1656 = vmatpush3.bf16.msra.mxu0 %v1653_v14 }
  0x1a   : > { %1566 = vmatmul.mubr.msk.f32.vlgmr.msra.gmra.mrb[0].mxu1 %vm287_vm3, %v376_v11  ;;  %1590 = vmatprep.subr.mxu0 %v1724_v37 }
  0x1b   : > { %1660 = vmatpush3.bf16.msra.mxu1 %v1657_v17  ;;  %v939_v17 = vld [vmem:[%s1957_s0 + $0x90] sm:$0xff] }
  0x1c   : > { %1662 = vmatprep.subr.bf16.mxu1 %v1661_v29 }
  0x1f   : > { %1664 = vmatpush3.bf16.msra.mxu1 %v1661_v29 }
  0x88   : > { %v854_v11 = vpop.permute.xlu0 %853 }
  0xe7   : > { %v1817_v18 = vpop.f32.mrb[0].mxu0 }
  0xe8   : > { %v1819_v19 = vpop.f32.mrb[1].mxu0 }
  0xed   : > { %v1567_v21 = vpop.f32.mrb[0].mxu1 }
  0xee   : > { %v557_v22 = vadd.f32 %v1567_v21, %v1479_v20  ;;  %v542_v23 = vpop.f32.mrb[1].mxu1  ;;  %v1728_v21 = vmov 0.0|0.0  }
  0xef   : > { %v556_v24 = vadd.f32 %v1479_v20, %v542_v23  ;;  %v940_v20 = vld [vmem:[%s1957_s0 + $0x98] sm:$0xff]  ;;  %1665 = vmatprep.subr.bf16.mxu1 %v1728_v21  ;;  %v941_v23 = vld [vmem:[%s1957_s0 + $0xa0] sm:$0xff] }
  0xf0   : > { %v559_v26 = vmax.f32 %v557_v22, 0.0  ;;  %v1666_v22 = vpack.c.bf16 %v939_v17, %v938_v16 }
  0xf1   : > { %v558_v25 = vmax.f32 %v556_v24, 0.0  ;;  %v1669_v24 = vpack.c.bf16 %v941_v23, %v940_v20 }
  0xf3   : > { %1576 = vmatprep.mubr.msk.f32.mxu0 %vm569_vm4, %v558_v25  ;;  %v1019_v25 = vld [vmem:[%s1957_s0 + $0xb0] sm:$0xff] }
  0xf4   : > { %1577 = vmatmul.mubr.msk.f32.vlgmr.msra.gmra.mrb[2].mxu0 %vm569_vm4, %v559_v26  ;;  %v1020_v26 = vld [vmem:[%s1957_s0 + $0xb8] sm:$0xff] }
  0xf5   : > { %1591 = vmatpush3.msra.mxu0 %v755_v38  ;;  %1592 = vmatprep.mubr.msk.f32.mxu0 %vm1725_vm5, %v1724_v37  ;;  %v1672_v27 = vpack.c.bf16 %v1020_v26, %v1019_v25 }
  0xf6   : > { %1595 = vmatprep.subr.mxu0 %v1724_v37 }
 0x1c7   : > { %v1578_v31 = vpop.f32.mrb[2].mxu0 }
 0x1c8   : > { %v648_v32 = vadd.f32 %v1578_v31, %v1480_v30  ;;  %v642_v33 = vpop.f32.mrb[3].mxu0 }
 0x1c9   : > { %v643_v34 = vadd.f32 %v1480_v30, %v642_v33  ;;  %v1104_v33 = vld [vmem:[%s1957_s0 + $0x108] sm:$0xff] }
 0x1ca   : > { %v652_v36 = vmax.f32 %v648_v32, 0.0 }
 0x1cb   : > { %v651_v35 = vmax.f32 %v643_v34, 0.0 }
 0x1cd   : > { %1587 = vmatprep.mubr.msk.f32.mxu1 %vm569_vm4, %v651_v35  ;;  %v1021_v35 = vld [vmem:[%s1957_s0 + $0xc0] sm:$0xff] }
 0x1ce   : > { %1588 = vmatmul.mubr.msk.f32.vlgmr.msra.gmra.mrb[2].mxu1 %vm569_vm4, %v652_v36  ;;  %v1022_v36 = vld [vmem:[%s1957_s0 + $0xc8] sm:$0xff] }
 0x1cf   : > { %1608 = vmatprep.mubr.msk.f32.mxu1 %vm1725_vm5, %v1724_v37  ;;  %1667 = vmatpush3.bf16.msra.mxu1 %v1666_v22  ;;  %v1675_v38 = vpack.c.bf16 %v1022_v36, %v1021_v35 }
 0x1d0   : > { %1668 = vmatprep.subr.bf16.mxu1 %v1728_v21 }
 0x1d3   : > { %1670 = vmatpush3.bf16.msra.mxu1 %v1669_v24 }
 0x1d4   : > { %1622 = vmatprep.subr.mxu1 %v1724_v37 }
 0x2a1   : > { %v1589_v41 = vpop.f32.mrb[2].mxu1 }
 0x2a2   : > { %v740_v42 = vadd.f32 %v1589_v41, %v1483_v40  ;;  %v734_v43 = vpop.f32.mrb[3].mxu1  ;;  %v1469_v41 = vld [vmem:[%s1957_s0 + $0xe0] ss:$0 sm:$0xff] }
 0x2a3   : > { %v735_v44 = vadd.f32 %v1483_v40, %v734_v43  ;;  %v365_v43 = vadd.f32 %v1469_v41, %v1819_v19  ;;  %v370_v19 = vadd.f32 %v1817_v18, %v1469_v41  ;;  %v1278_v18 = vld [vmem:[%s1957_s0 + $0x128] sm:$0xff] }
 0x2a4   : > { %v745_v45 = vsel %vm743_vm6, %v740_v42, 0.0  ;;  %v942_v42 = vld [vmem:[%s1957_s0 + $0xa8] sm:$0x1] }
 0x2a5   : > { %v744_v46 = vsel %vm743_vm6, %v735_v44, 0.0 }
 0x2a6   : > { %v746_v47 = vadd.f32 %v745_v45, %v744_v46  ;;  %v1181_v45 = vld [vmem:[%s1957_s0 + $0xf8] sm:$0xff]  ;;  %v1182_v46 = vld [vmem:[%s1957_s0 + $0x100] sm:$0xff] }
 0x2a8   : > { %v747_v48 = vrot.slane %v746_v47, 4 }
 0x2aa   : > { %v748_v49 = vadd.f32 %v747_v48, %v746_v47 }
 0x2ac   : > { %v749_v50 = vrot.slane %v748_v49, 2 }
 0x2ae   : > { %v750_v51 = vadd.f32 %v749_v50, %v748_v49  ;;  %v1681_v50 = vpack.c.bf16 %v1182_v46, %v1181_v45 }
 0x2b0   : > { %v751_v52 = vrot.slane %v750_v51, 1 }
 0x2b2   : > { %v752_v53 = vadd.f32 %v751_v52, %v750_v51  ;;  %v373_v51 = vmax.f32 %v365_v43, 0.0 }
 0x2b4   : > { %v754_v54 = vmul.f32 0.0625, %v752_v53 }
 0x2b6   : > { %1593 = vmatmul.mubr.msk.f32.vlgmr.msra.gmra.mrb[4].mxu0 %vm743_vm6, %v754_v54  ;;  %v374_v54 = vmax.f32 %v370_v19, 0.0 }
 0x2b7   : > { %1597 = vmatprep.mubr.msk.f32.mxu0 %vm1725_vm5, %v1724_v37  ;;  %1596 = vmatpush3.msra.mxu0 %v862_v55  ;;  %v1276_v55 = vld [vmem:[%s1957_s0 + $0x118] sm:$0xff] }
 0x2b8   : > { %1671 = vmatprep.subr.bf16.mxu0 %v1728_v21 }
 0x389   : > { %v826_v57 = vpop.f32.mrb[4].mxu0 }
 0x38a   : > { %v827_v58 = vadd.f32 %v826_v57, %v756_v56  ;;  %v1594_v59 = vpop.f32.mrb[5].mxu0  ;;  %v1277_v56 = vld [vmem:[%s1957_s0 + $0x120] sm:$0xff] }
 0x38b   : > { %v1685_v57 = vpack.c.bf16 %v1277_v56, %v1276_v55 }
 0x38c   : > { %v831_v60 = vand.u32 2147483647, %v827_v58  ;;  %v830_v7 = vmax.f32 %v827_v58, 0.0 }
 0x38e   : > { %v832_v61 = vsub.f32 0.0, %v831_v60  ;;  %v1183_v60 = vlaneseq }
 0x390   : > { %v833_v62 = vmul.f32 1.442695, %v832_v61  ;;  %v1023_v61 = vld [vmem:[%s1957_s0 + $0xd0] sm:$0x1] }
 0x392   : > { %1708 = vpow2.f32 %v833_v62  ;;  %v1184_v62 = vshrl.u32 %v1183_v60, 7 }
 0x39c   : > { %v1709_v63 = vpop.eup %1708 }
 0x39d   : > { %v835_v0 = vadd.f32 1.0, %v1709_v63  ;;  %v838_v1 = vmul.f32 -0.5, %v1709_v63  ;;  %v841_v3 = vand.u32 2147483647, %v1709_v63 }
 0x39f   : > { %1710 = vlog2.f32 %v835_v0  ;;  %v839_v2 = vadd.f32 1.0, %v838_v1  ;;  %vm842_vm7 = vcmp.lt.f32.partialorder %v841_v3, 0.0004427343 }
 0x3a1   : > { %v840_v6 = vmul.f32 %v1709_v63, %v839_v2  ;;  %v1105_v63 = vld [vmem:[%s1957_s0 + $0x110] sm:$0x1] }
 0x3a9   : > { %v1711_v4 = vpop.eup %1710 }
 0x3aa   : > { %v837_v5 = vmul.f32 0.6931472, %v1711_v4 }
 0x3ac   : > { %v843_v8 = vsel %vm842_vm7, %v840_v6, %v837_v5  ;;  %v1185_v5 = vsub.s32 0, %v1184_v62 }
 0x3ad   : > { %v844_v9 = vadd.f32 %v843_v8, %v830_v7 }
 0x3af   : > { %v845_v10 = vmul.f32 0.9, %v844_v9 }
 0x3b1   : > { %v846_v12 = vadd.f32 0.1, %v845_v10 }
 0x3b3   : > { %v856_v13 = vmul.f32 %v854_v11, %v846_v12 }
 0x3b5   : > { %858 = vrot.lane.b32.xlu0 %v856_v13, %s1727_s22 }
 0x427   : > { %v859_v14 = vpop.permute.xlu0 %858 }
 0x428   : > { %v861_v15 = vadd.f32 %v859_v14, %v827_v58  ;;  %v1279_v58 = vld [vmem:[%s1957_s0 + $0x130] sm:$0xff] }
 0x429   : > { %v1689_v59 = vpack.c.bf16 %v1279_v58, %v1278_v18 }
 0x42a   : > { %1598 = vmatmul.mubr.msk.f32.vlgmr.msra.gmra.mrb[6].mxu0 %vm743_vm6, %v861_v15 }
 0x42b   : > { %1619 = vmatprep.mubr.msk.f32.mxu0 %vm1725_vm5, %v1724_v37  ;;  %1673 = vmatpush3.bf16.msra.mxu0 %v1672_v27 }
 0x42c   : > { %1674 = vmatprep.subr.bf16.mxu0 %v1728_v21  ;;  %v1495_v21 = vld [vmem:[%s1957_s0 + $0x138] ss:$0 sm:$0xff] }
 0x42f   : > { %1676 = vmatpush3.bf16.msra.mxu0 %v1675_v38 }
 0x4fd   : > { %v933_v29 = vpop.f32.mrb[6].mxu0 }
 0x4fe   : > { %v934_v30 = vadd.f32 %v933_v29, %v863_v28  ;;  %v1599_v31 = vpop.f32.mrb[7].mxu0 }
 0x500   : > { %v937_v32 = vmax.f32 %v934_v30, 0.0 }
 0x502   : > { %944 = vrot.lane.b32.xlu1 %v937_v32, %s1727_s22 }
 0x574   : > { %v945_v34 = vpop.permute.xlu1 %944 }
 0x575   : > { %1609 = vmatmul.mubr.msk.f32.vlgmr.msra.gmra.mrb[4].mxu1 %vm569_vm4, %v945_v34 }
 0x576   : > { %1623 = vmatpush3.msra.mxu1 %v1104_v33  ;;  %1624 = vmatprep.mubr.msk.f32.mxu1 %vm1725_vm5, %v1724_v37  ;;  %v1180_v37 = vld [vmem:[%s1957_s0 + $0xf0] sm:$0xff] }
 0x577   : > { %v1677_v40 = vpack.c.bf16 %v1180_v37, %v1179_v39  ;;  %1686 = vmatprep.subr.bf16.mxu1 %v1685_v57 }
 0x579   : > { %1625 = vmatmul.mubr.msk.f32.vlgmr.msra.gmra.mrb[6].mxu1 %vm743_vm6, %v934_v30  ;;  %1678 = vmatprep.subr.bf16.mxu0 %v1677_v40 }
 0x57a   : > { %1688 = vmatpush3.bf16.msra.mxu1 %v1685_v57 }
 0x57b   : > { %1690 = vmatprep.subr.bf16.mxu1 %v1689_v59 }
 0x57e   : > { %1692 = vmatpush3.bf16.msra.mxu1 %v1689_v59 }
 0x648   : > { %v1014_v44 = vpop.f32.mrb[4].mxu1 }
 0x649   : > { %v1015_v47 = vadd.f32 %v1014_v44, %v942_v42  ;;  %v1610_v48 = vpop.f32.mrb[5].mxu1 }
 0x64b   : > { %v1018_v49 = vmax.f32 %v1015_v47, 0.0 }
 0x64c   : > { %v1175_v52 = vpop.f32.mrb[6].mxu1 }
 0x64d   : > { %1620 = vmatmul.mubr.msk.f32.vlgmr.msra.gmra.mrb[8].mxu0 %vm569_vm4, %v1018_v49  ;;  %v1626_v53 = vpop.f32.mrb[7].mxu1  ;;  %v1176_v3 = vadd.f32 %v1175_v52, %v1105_v63 }
 0x64e   : > { %1680 = vmatpush3.bf16.msra.mxu0 %v1677_v40  ;;  %1635 = vmatprep.mubr.msk.f32.mxu0 %vm569_vm4, %v373_v51 }
 0x64f   : > { %1682 = vmatprep.subr.bf16.mxu0 %v1681_v50  ;;  %v1186_v6 = vrot.slane %v1176_v3, %v1185_v5 }
 0x652   : > { %1684 = vmatpush3.bf16.msra.mxu0 %v1681_v50 }
 0x655   : > { %1636 = vmatmul.mubr.msk.f32.vlgmr.msra.gmra.mrb[10].mxu0 %vm569_vm4, %v374_v54 }
 0x720   : > { %v1093_v0 = vpop.f32.mrb[8].mxu0 }
 0x721   : > { %v1094_v1 = vadd.f32 %v1093_v0, %v1023_v61  ;;  %v1621_v2 = vpop.f32.mrb[9].mxu0 }
 0x723   : > { %v1491_v4 = vmul.f32 -1.442695, %v1094_v1 }
 0x725   : > { %1712 = vpow2.f32 %v1491_v4 }
 0x728   : > { %v1637_v7 = vpop.f32.mrb[10].mxu0 }
 0x729   : > { %v1265_v8 = vadd.f32 %v1637_v7, %v1186_v6  ;;  %v1259_v9 = vpop.f32.mrb[11].mxu0 }
 0x72a   : > { %v1260_v10 = vadd.f32 %v1259_v9, %v1186_v6 }
 0x72b   : > { %v1269_v14 = vmax.f32 %v1265_v8, 0.0 }
 0x72c   : > { %v1268_v16 = vmax.f32 %v1260_v10, 0.0 }
 0x72f   : > { %v1713_v11 = vpop.eup %1712 }
 0x730   : > { %v1101_v12 = vadd.f32 1.0, %v1713_v11 }
 0x732   : > { %1714 = vrcp.f32 %v1101_v12 }
 0x73c   : > { %v1715_v13 = vpop.eup %1714 }
 0x73d   : > { %v1273_v15 = vrot.slane %v1715_v13, %v1185_v5 }
 0x73f   : > { %v1275_v17 = vmul.f32 %v1273_v15, %v1269_v14  ;;  %v1274_v20 = vmul.f32 %v1273_v15, %v1268_v16 }
 0x741   : > { %1646 = vmatprep.mubr.msk.f32.mxu1 %vm569_vm4, %v1274_v20 }
 0x742   : > { %1647 = vmatmul.mubr.msk.f32.vlgmr.msra.gmra.mrb[8].mxu1 %vm569_vm4, %v1275_v17 }
 0x815   : > { %v1648_v22 = vpop.f32.mrb[8].mxu1 }
 0x816   : > { %v1363_v23 = vadd.f32 %v1648_v22, %v1495_v21  ;;  %v1357_v24 = vpop.f32.mrb[9].mxu1 }
 0x817   : > { %v1358_v25 = vadd.f32 %v1495_v21, %v1357_v24 }
 0x818   : > { %1367 = vst.msk [vmem:[%s278_s25 + $0x8] sm:$0xff] %vm381_vm2, %v1363_v23 }
 0x819   : > { %1366 = vst.msk [vmem:[%s278_s25] sm:$0xff] %vm381_vm2, %v1358_v25 }
 0x81a PF: > { %s15_s18 = sadd.s32 1, %s1722_s18  }
 0x81b   : > { %p12_p4 = scmp.ge.s32.totalorder %s15_s18, 10  }
 0x81d   :  { %14 = sbr.rel (!%p12_p4) target bundleno = 1 (0x1), region = 79 }

</bundles_post_ra>
